<compile_context>
chip_gen: v7x
topology: tpu7x:2x2x1
jax: 0.10.0
libtpu: 0.0.40
codegen_flags: <defaults>
</compile_context>

<pallas_src>
import jax
import jax.numpy as jnp
from jax import lax
from jax.experimental import pallas as pl
from jax.experimental.pallas import tpu as pltpu


def _round_up(x, m):
    return (x + m - 1) // m * m


def _pick_seq_chunk(S, max_chunk=16):
    ts = min(S, max_chunk)
    while S % ts != 0:
        ts -= 1
    return ts


def _lstm_chunk_kernel(x_ref, wih_ref, whh_ref, bias_ref, wout_ref, bout_ref,
                       y_ref, gx_scr, h_scr, c_scr):
    TS, TB, E = x_ref.shape
    Hp = whh_ref.shape[0]                       # padded hidden size (multiple of 128)
    s = pl.program_id(1)

    @pl.when(s == 0)
    def _():
        h_scr[...] = jnp.zeros_like(h_scr)      # zero initial hidden / cell state
        c_scr[...] = jnp.zeros_like(c_scr)

    # Hoisted input projection: one (TS*TB, E) @ (E, 4Hp) MXU matmul per chunk,
    # bias folded in once (not re-broadcast per timestep).
    x_chunk = x_ref[...].reshape(TS * TB, E)    # bf16
    gx = jnp.dot(x_chunk, wih_ref[...], preferred_element_type=jnp.float32)
    gx_scr[...] = (gx + bias_ref[...]).reshape(TS, TB, 4 * Hp)

    whh = whh_ref[...]                          # (Hp, 4Hp) resident, f32

    def step(t, carry):
        h, c = carry
        # Only the h-projection remains on the serial chain.
        gates = gx_scr[t] + jnp.dot(h, whh, preferred_element_type=jnp.float32)
        # Lane-aligned gate slabs (each Hp = multiple of 128). PyTorch order: i, f, g, o.
        i_g = jax.nn.sigmoid(gates[:, 0 * Hp:1 * Hp])
        f_g = jax.nn.sigmoid(gates[:, 1 * Hp:2 * Hp])
        g_g = jnp.tanh(gates[:, 2 * Hp:3 * Hp])
        o_g = jax.nn.sigmoid(gates[:, 3 * Hp:4 * Hp])
        c_new = f_g * c + i_g * g_g
        h_new = o_g * jnp.tanh(c_new)
        return (h_new, c_new)

    h_f, c_f = lax.fori_loop(0, TS, step, (h_scr[...], c_scr[...]), unroll=True)
    h_scr[...] = h_f
    c_scr[...] = c_f

    @pl.when(s == pl.num_programs(1) - 1)
    def _():
        # hidden2label on the last timestep's hidden state (lane-dense padded logits).
        y_ref[...] = (jnp.dot(h_f, wout_ref[...], preferred_element_type=jnp.float32)
                      + bout_ref[...])


def lstm_classifier_forward(sentence, params, *, seq_chunk=None):
    """sentence: (S, B) int32 token ids. Returns logits (B, L) float32."""
    emb = params["embedding"]                   # (V, E)
    S, B = sentence.shape
    E = emb.shape[1]
    H = params["w_hh"].shape[1]
    L = params["w_out"].shape[0]

    Hp = _round_up(H, 128)                      # lane-aligned gate slabs
    Lp = _round_up(L, 128)                      # lane-dense logits store
    Bp = _round_up(B, 8)                        # sublane-aligned batch
    TB = Bp if Bp <= 256 else 256
    Bp = _round_up(Bp, TB)
    TS = seq_chunk if seq_chunk is not None else _pick_seq_chunk(S)
    assert S % TS == 0, "sequence length must be divisible by the chunk size"

    # TODO(synk): embedding gather stays in JAX glue; an in-kernel scalar-prefetch
    # row-gather (pl.Element) would avoid materializing (S, B, E) in HBM.
    x = jnp.take(emb, sentence, axis=0).astype(jnp.bfloat16)       # (S, B, E)
    if Bp != B:
        x = jnp.pad(x, ((0, 0), (0, Bp - B), (0, 0)))

    def pad_gate_rows(w):  # (4H, ...) -> (4Hp, ...), zero-pad each gate block to Hp
        w4 = w.reshape(4, H, *w.shape[1:])
        pad = [(0, 0), (0, Hp - H)] + [(0, 0)] * (w.ndim - 1)
        return jnp.pad(w4, pad).reshape(4 * Hp, *w.shape[1:])

    wih_t = pad_gate_rows(params["w_ih"]).T.astype(jnp.bfloat16)           # (E, 4Hp)
    whh_p = jnp.pad(pad_gate_rows(params["w_hh"]), ((0, 0), (0, Hp - H)))
    whh_t = whh_p.T.astype(jnp.float32)                                    # (Hp, 4Hp)
    bias = pad_gate_rows((params["b_ih"] + params["b_hh"])[:, None])[:, 0]
    bias = bias[None, :].astype(jnp.float32)                               # (1, 4Hp)
    wout_t = jnp.pad(params["w_out"], ((0, Lp - L), (0, Hp - H))).T.astype(jnp.float32)
    bout = jnp.pad(params["b_out"], (0, Lp - L))[None, :].astype(jnp.float32)

    grid = (Bp // TB, S // TS)

    # Explicit VMEM budget: double-buffered x chunk + resident weights + scratch, with headroom.
    est = (2 * TS * TB * E * 2 + E * 4 * Hp * 2 + Hp * 4 * Hp * 4 + 4 * Hp * 4
           + Hp * Lp * 4 + Lp * 4 + TS * TB * 4 * Hp * 4 + 2 * TB * Hp * 4
           + 2 * TB * Lp * 4)
    vmem_limit = int(min(max(4 * est, 16 * 2**20), 48 * 2**20))

    y_pad = pl.pallas_call(
        _lstm_chunk_kernel,
        out_shape=jax.ShapeDtypeStruct((Bp, Lp), jnp.float32),
        grid_spec=pltpu.PrefetchScalarGridSpec(
            num_scalar_prefetch=0,
            grid=grid,
            in_specs=[
                pl.BlockSpec((TS, TB, E), lambda b, s: (s, b, 0)),     # streamed x chunks
                pl.BlockSpec((E, 4 * Hp), lambda b, s: (0, 0)),        # resident weights
                pl.BlockSpec((Hp, 4 * Hp), lambda b, s: (0, 0)),
                pl.BlockSpec((1, 4 * Hp), lambda b, s: (0, 0)),
                pl.BlockSpec((Hp, Lp), lambda b, s: (0, 0)),
                pl.BlockSpec((1, Lp), lambda b, s: (0, 0)),
            ],
            out_specs=pl.BlockSpec((TB, Lp), lambda b, s: (b, 0)),
            scratch_shapes=[
                pltpu.VMEM((TS, TB, 4 * Hp), jnp.float32),   # per-chunk x-projected gates
                pltpu.VMEM((TB, Hp), jnp.float32),           # h (persists across chunks)
                pltpu.VMEM((TB, Hp), jnp.float32),           # c
            ],
        ),
        compiler_params=pltpu.CompilerParams(
            dimension_semantics=("parallel", "arbitrary"),
            vmem_limit_bytes=vmem_limit,
        ),
    )(x, wih_t, whh_t, bias, wout_t, bout)

    return y_pad[:B, :L]


def init_params(key, vocab_size, embedding_dim, hidden_dim, label_size):
    ks = jax.random.split(key, 7)
    k_lstm = 1.0 / jnp.sqrt(hidden_dim)
    k_lin = 1.0 / jnp.sqrt(hidden_dim)
    u = lambda k, shape, lim: jax.random.uniform(k, shape, jnp.float32, -lim, lim)
    return {
        "embedding": jax.random.normal(ks[0], (vocab_size, embedding_dim), jnp.float32),
        "w_ih": u(ks[1], (4 * hidden_dim, embedding_dim), k_lstm),
        "w_hh": u(ks[2], (4 * hidden_dim, hidden_dim), k_lstm),
        "b_ih": u(ks[3], (4 * hidden_dim,), k_lstm),
        "b_hh": u(ks[4], (4 * hidden_dim,), k_lstm),
        "w_out": u(ks[5], (label_size, hidden_dim), k_lin),
        "b_out": u(ks[6], (label_size,), k_lin),
    }


def _reference_forward(sentence, params):
    """Pure-JAX f32 reference of the same forward pass (sanity check)."""
    x = jnp.take(params["embedding"], sentence, axis=0).astype(jnp.float32)
    S, B, _ = x.shape
    H = params["w_hh"].shape[1]
    h = jnp.zeros((B, H), jnp.float32)
    c = jnp.zeros((B, H), jnp.float32)
    bias = params["b_ih"] + params["b_hh"]
    for t in range(S):
        gates = x[t] @ params["w_ih"].T + h @ params["w_hh"].T + bias
        i_g = jax.nn.sigmoid(gates[:, 0 * H:1 * H])
        f_g = jax.nn.sigmoid(gates[:, 1 * H:2 * H])
        g_g = jnp.tanh(gates[:, 2 * H:3 * H])
        o_g = jax.nn.sigmoid(gates[:, 3 * H:4 * H])
        c = f_g * c + i_g * g_g
        h = o_g * jnp.tanh(c)
    return h @ params["w_out"].T + params["b_out"]


if __name__ == "__main__":
    vocab_size = 50
    embedding_dim = 16
    hidden_dim = 32
    label_size = 4
    batch_size = 2
    seq_len = 8

    key = jax.random.PRNGKey(0)
    k_param, k_sent = jax.random.split(key)
    params = init_params(k_param, vocab_size, embedding_dim, hidden_dim, label_size)

    sentence = jax.random.randint(k_sent, (seq_len, batch_size), 0, vocab_size, jnp.int32)

    # seq_chunk=4 -> two sequence-grid steps, exercising the persistent h/c carry.
    y = lstm_classifier_forward(sentence, params, seq_chunk=4)
    y = jax.block_until_ready(y)

    y_ref = _reference_forward(sentence, params)
    assert y.shape == (batch_size, label_size)
    # bf16 x / W_ih projection -> slightly looser tolerance than the pure-f32 check.
    assert jnp.allclose(y, y_ref, rtol=2e-2, atol=2e-2)

    print("KERNEL_OK")
</pallas_src>

<mosaic_0001>
module attributes {stable_mosaic.version = 11 : i64} {
  func.func @_lstm_chunk_kernel(%arg0: i32, %arg1: i32, %arg2: memref<4x8x16xbf16, #tpu.memory_space<vmem>>, %arg3: memref<16x512xbf16, #tpu.memory_space<vmem>>, %arg4: memref<128x512xf32, #tpu.memory_space<vmem>>, %arg5: memref<1x512xf32, #tpu.memory_space<vmem>>, %arg6: memref<128x128xf32, #tpu.memory_space<vmem>>, %arg7: memref<1x128xf32, #tpu.memory_space<vmem>>, %arg8: memref<8x128xf32, #tpu.memory_space<vmem>>, %arg9: memref<4x8x512xf32, #tpu.memory_space<vmem>>, %arg10: memref<8x128xf32, #tpu.memory_space<vmem>>, %arg11: memref<8x128xf32, #tpu.memory_space<vmem>>) attributes {dimension_semantics = [#tpu.dimension_semantics<parallel>, #tpu.dimension_semantics<arbitrary>], iteration_bounds = array<i64: 1, 2>, scalar_prefetch = 0 : i64, scratch_operands = 3 : i64, tpu.core_type = #tpu.core_type<tc>, window_params = [{transform_indices = @transform_0, window_bounds = array<i64: 4, 8, 16>}, {pipeline_mode = #tpu.pipeline_mode<synchronous>, transform_indices = @transform_1, window_bounds = array<i64: 16, 512>}, {pipeline_mode = #tpu.pipeline_mode<synchronous>, transform_indices = @transform_2, window_bounds = array<i64: 128, 512>}, {pipeline_mode = #tpu.pipeline_mode<synchronous>, transform_indices = @transform_3, window_bounds = array<i64: 1, 512>}, {pipeline_mode = #tpu.pipeline_mode<synchronous>, transform_indices = @transform_4, window_bounds = array<i64: 128, 128>}, {pipeline_mode = #tpu.pipeline_mode<synchronous>, transform_indices = @transform_5, window_bounds = array<i64: 1, 128>}, {transform_indices = @transform_6, window_bounds = array<i64: 8, 128>}]} {
    %c0_i32 = arith.constant 0 : i32
    %0 = arith.cmpi eq, %arg1, %c0_i32 : i32
    %1 = arith.extui %0 : i1 to i32
    %c0_i32_0 = arith.constant 0 : i32
    %2 = arith.cmpi ne, %1, %c0_i32_0 : i32
    scf.if %2 {
      %cst_47 = arith.constant 0.000000e+00 : f32
      %140 = vector.broadcast %cst_47 : f32 to vector<8x128xf32>
      %c0_48 = arith.constant 0 : index
      %c0_49 = arith.constant 0 : index
      %141 = vector.load %arg10[%c0_48, %c0_49] : memref<8x128xf32, #tpu.memory_space<vmem>>, vector<8x128xf32>
      tpu.vector_store %arg10[%c0_48, %c0_49], %140 {strides = array<i32>} : memref<8x128xf32, #tpu.memory_space<vmem>>, vector<8x128xf32>,
      %cst_50 = arith.constant 0.000000e+00 : f32
      %142 = vector.broadcast %cst_50 : f32 to vector<8x128xf32>
      %c0_51 = arith.constant 0 : index
      %c0_52 = arith.constant 0 : index
      %143 = vector.load %arg11[%c0_51, %c0_52] : memref<8x128xf32, #tpu.memory_space<vmem>>, vector<8x128xf32>
      tpu.vector_store %arg11[%c0_51, %c0_52], %142 {strides = array<i32>} : memref<8x128xf32, #tpu.memory_space<vmem>>, vector<8x128xf32>,
    } else {
    }
    %c0 = arith.constant 0 : index
    %c0_1 = arith.constant 0 : index
    %c0_2 = arith.constant 0 : index
    %3 = vector.load %arg2[%c0, %c0_1, %c0_2] : memref<4x8x16xbf16, #tpu.memory_space<vmem>>, vector<4x8x16xbf16>
    %4 = vector.shape_cast %3 : vector<4x8x16xbf16> to vector<32x16xbf16>
    %c0_3 = arith.constant 0 : index
    %c0_4 = arith.constant 0 : index
    %5 = vector.load %arg3[%c0_3, %c0_4] : memref<16x512xbf16, #tpu.memory_space<vmem>>, vector<16x512xbf16>
    %cst = arith.constant dense<0.000000e+00> : vector<32x512xf32>
    %6 = tpu.matmul %4, %5, %cst {dimension_numbers = #tpu.dot_dimension_numbers<[1], [0], [0], [1], [0, 0, 1, 1], [], []>} : vector<32x16xbf16>, vector<16x512xbf16>, vector<32x512xf32> -> vector<32x512xf32>
    %c0_5 = arith.constant 0 : index
    %c0_6 = arith.constant 0 : index
    %7 = vector.load %arg5[%c0_5, %c0_6] : memref<1x512xf32, #tpu.memory_space<vmem>>, vector<1x512xf32>
    %8 = vector.broadcast %7 : vector<1x512xf32> to vector<32x512xf32>
    %9 = arith.addf %6, %8 : vector<32x512xf32>
    %10 = vector.shape_cast %9 : vector<32x512xf32> to vector<4x8x512xf32>
    %c0_7 = arith.constant 0 : index
    %c0_8 = arith.constant 0 : index
    %c0_9 = arith.constant 0 : index
    %11 = vector.load %arg9[%c0_7, %c0_8, %c0_9] : memref<4x8x512xf32, #tpu.memory_space<vmem>>, vector<4x8x512xf32>
    tpu.vector_store %arg9[%c0_7, %c0_8, %c0_9], %10 {strides = array<i32>} : memref<4x8x512xf32, #tpu.memory_space<vmem>>, vector<4x8x512xf32>,
    %c0_10 = arith.constant 0 : index
    %c0_11 = arith.constant 0 : index
    %12 = vector.load %arg4[%c0_10, %c0_11] : memref<128x512xf32, #tpu.memory_space<vmem>>, vector<128x512xf32>
    %c0_12 = arith.constant 0 : index
    %c0_13 = arith.constant 0 : index
    %13 = vector.load %arg10[%c0_12, %c0_13] : memref<8x128xf32, #tpu.memory_space<vmem>>, vector<8x128xf32>
    %c0_14 = arith.constant 0 : index
    %c0_15 = arith.constant 0 : index
    %14 = vector.load %arg11[%c0_14, %c0_15] : memref<8x128xf32, #tpu.memory_space<vmem>>, vector<8x128xf32>
    %c0_i32_16 = arith.constant 0 : i32
    %15 = arith.index_cast %c0_i32_16 : i32 to index
    %c0_17 = arith.constant 0 : index
    %c0_18 = arith.constant 0 : index
    %16 = vector.load %arg9[%15, %c0_17, %c0_18] : memref<4x8x512xf32, #tpu.memory_space<vmem>>, vector<1x8x512xf32>
    %17 = vector.shape_cast %16 : vector<1x8x512xf32> to vector<8x512xf32>
    %cst_19 = arith.constant dense<0.000000e+00> : vector<8x512xf32>
    %18 = tpu.matmul %13, %12, %cst_19 {dimension_numbers = #tpu.dot_dimension_numbers<[1], [0], [0], [1], [0, 0, 1, 1], [], []>} : vector<8x128xf32>, vector<128x512xf32>, vector<8x512xf32> -> vector<8x512xf32>
    %19 = arith.addf %17, %18 : vector<8x512xf32>
    %20 = vector.extract_strided_slice %19 {offsets = [0, 0], sizes = [8, 128], strides = [1, 1]} : vector<8x512xf32> to vector<8x128xf32>
    %21 = arith.negf %20 : vector<8x128xf32>
    %22 = math.exp %21 : vector<8x128xf32>
    %cst_20 = arith.constant 1.000000e+00 : f32
    %23 = vector.broadcast %cst_20 : f32 to vector<8x128xf32>
    %24 = arith.addf %23, %22 : vector<8x128xf32>
    %25 = arith.divf %23, %24 : vector<8x128xf32>
    %26 = vector.extract_strided_slice %19 {offsets = [0, 128], sizes = [8, 128], strides = [1, 1]} : vector<8x512xf32> to vector<8x128xf32>
    %27 = arith.negf %26 : vector<8x128xf32>
    %28 = math.exp %27 : vector<8x128xf32>
    %cst_21 = arith.constant 1.000000e+00 : f32
    %29 = vector.broadcast %cst_21 : f32 to vector<8x128xf32>
    %30 = arith.addf %29, %28 : vector<8x128xf32>
    %31 = arith.divf %29, %30 : vector<8x128xf32>
    %32 = vector.extract_strided_slice %19 {offsets = [0, 256], sizes = [8, 128], strides = [1, 1]} : vector<8x512xf32> to vector<8x128xf32>
    %33 = math.tanh %32 : vector<8x128xf32>
    %34 = vector.extract_strided_slice %19 {offsets = [0, 384], sizes = [8, 128], strides = [1, 1]} : vector<8x512xf32> to vector<8x128xf32>
    %35 = arith.negf %34 : vector<8x128xf32>
    %36 = math.exp %35 : vector<8x128xf32>
    %cst_22 = arith.constant 1.000000e+00 : f32
    %37 = vector.broadcast %cst_22 : f32 to vector<8x128xf32>
    %38 = arith.addf %37, %36 : vector<8x128xf32>
    %39 = arith.divf %37, %38 : vector<8x128xf32>
    %40 = arith.mulf %31, %14 : vector<8x128xf32>
    %41 = arith.mulf %25, %33 : vector<8x128xf32>
    %42 = arith.addf %40, %41 : vector<8x128xf32>
    %43 = math.tanh %42 : vector<8x128xf32>
    %44 = arith.mulf %39, %43 : vector<8x128xf32>
    %c1_i32 = arith.constant 1 : i32
    %45 = arith.index_cast %c1_i32 : i32 to index
    %c0_23 = arith.constant 0 : index
    %c0_24 = arith.constant 0 : index
    %46 = vector.load %arg9[%45, %c0_23, %c0_24] : memref<4x8x512xf32, #tpu.memory_space<vmem>>, vector<1x8x512xf32>
    %47 = vector.shape_cast %46 : vector<1x8x512xf32> to vector<8x512xf32>
    %cst_25 = arith.constant dense<0.000000e+00> : vector<8x512xf32>
    %48 = tpu.matmul %44, %12, %cst_25 {dimension_numbers = #tpu.dot_dimension_numbers<[1], [0], [0], [1], [0, 0, 1, 1], [], []>} : vector<8x128xf32>, vector<128x512xf32>, vector<8x512xf32> -> vector<8x512xf32>
    %49 = arith.addf %47, %48 : vector<8x512xf32>
    %50 = vector.extract_strided_slice %49 {offsets = [0, 0], sizes = [8, 128], strides = [1, 1]} : vector<8x512xf32> to vector<8x128xf32>
    %51 = arith.negf %50 : vector<8x128xf32>
    %52 = math.exp %51 : vector<8x128xf32>
    %cst_26 = arith.constant 1.000000e+00 : f32
    %53 = vector.broadcast %cst_26 : f32 to vector<8x128xf32>
    %54 = arith.addf %53, %52 : vector<8x128xf32>
    %55 = arith.divf %53, %54 : vector<8x128xf32>
    %56 = vector.extract_strided_slice %49 {offsets = [0, 128], sizes = [8, 128], strides = [1, 1]} : vector<8x512xf32> to vector<8x128xf32>
    %57 = arith.negf %56 : vector<8x128xf32>
    %58 = math.exp %57 : vector<8x128xf32>
    %cst_27 = arith.constant 1.000000e+00 : f32
    %59 = vector.broadcast %cst_27 : f32 to vector<8x128xf32>
    %60 = arith.addf %59, %58 : vector<8x128xf32>
    %61 = arith.divf %59, %60 : vector<8x128xf32>
    %62 = vector.extract_strided_slice %49 {offsets = [0, 256], sizes = [8, 128], strides = [1, 1]} : vector<8x512xf32> to vector<8x128xf32>
    %63 = math.tanh %62 : vector<8x128xf32>
    %64 = vector.extract_strided_slice %49 {offsets = [0, 384], sizes = [8, 128], strides = [1, 1]} : vector<8x512xf32> to vector<8x128xf32>
    %65 = arith.negf %64 : vector<8x128xf32>
    %66 = math.exp %65 : vector<8x128xf32>
    %cst_28 = arith.constant 1.000000e+00 : f32
    %67 = vector.broadcast %cst_28 : f32 to vector<8x128xf32>
    %68 = arith.addf %67, %66 : vector<8x128xf32>
    %69 = arith.divf %67, %68 : vector<8x128xf32>
    %70 = arith.mulf %61, %42 : vector<8x128xf32>
    %71 = arith.mulf %55, %63 : vector<8x128xf32>
    %72 = arith.addf %70, %71 : vector<8x128xf32>
    %73 = math.tanh %72 : vector<8x128xf32>
    %74 = arith.mulf %69, %73 : vector<8x128xf32>
    %c2_i32 = arith.constant 2 : i32
    %75 = arith.index_cast %c2_i32 : i32 to index
    %c0_29 = arith.constant 0 : index
    %c0_30 = arith.constant 0 : index
    %76 = vector.load %arg9[%75, %c0_29, %c0_30] : memref<4x8x512xf32, #tpu.memory_space<vmem>>, vector<1x8x512xf32>
    %77 = vector.shape_cast %76 : vector<1x8x512xf32> to vector<8x512xf32>
    %cst_31 = arith.constant dense<0.000000e+00> : vector<8x512xf32>
    %78 = tpu.matmul %74, %12, %cst_31 {dimension_numbers = #tpu.dot_dimension_numbers<[1], [0], [0], [1], [0, 0, 1, 1], [], []>} : vector<8x128xf32>, vector<128x512xf32>, vector<8x512xf32> -> vector<8x512xf32>
    %79 = arith.addf %77, %78 : vector<8x512xf32>
    %80 = vector.extract_strided_slice %79 {offsets = [0, 0], sizes = [8, 128], strides = [1, 1]} : vector<8x512xf32> to vector<8x128xf32>
    %81 = arith.negf %80 : vector<8x128xf32>
    %82 = math.exp %81 : vector<8x128xf32>
    %cst_32 = arith.constant 1.000000e+00 : f32
    %83 = vector.broadcast %cst_32 : f32 to vector<8x128xf32>
    %84 = arith.addf %83, %82 : vector<8x128xf32>
    %85 = arith.divf %83, %84 : vector<8x128xf32>
    %86 = vector.extract_strided_slice %79 {offsets = [0, 128], sizes = [8, 128], strides = [1, 1]} : vector<8x512xf32> to vector<8x128xf32>
    %87 = arith.negf %86 : vector<8x128xf32>
    %88 = math.exp %87 : vector<8x128xf32>
    %cst_33 = arith.constant 1.000000e+00 : f32
    %89 = vector.broadcast %cst_33 : f32 to vector<8x128xf32>
    %90 = arith.addf %89, %88 : vector<8x128xf32>
    %91 = arith.divf %89, %90 : vector<8x128xf32>
    %92 = vector.extract_strided_slice %79 {offsets = [0, 256], sizes = [8, 128], strides = [1, 1]} : vector<8x512xf32> to vector<8x128xf32>
    %93 = math.tanh %92 : vector<8x128xf32>
    %94 = vector.extract_strided_slice %79 {offsets = [0, 384], sizes = [8, 128], strides = [1, 1]} : vector<8x512xf32> to vector<8x128xf32>
    %95 = arith.negf %94 : vector<8x128xf32>
    %96 = math.exp %95 : vector<8x128xf32>
    %cst_34 = arith.constant 1.000000e+00 : f32
    %97 = vector.broadcast %cst_34 : f32 to vector<8x128xf32>
    %98 = arith.addf %97, %96 : vector<8x128xf32>
    %99 = arith.divf %97, %98 : vector<8x128xf32>
    %100 = arith.mulf %91, %72 : vector<8x128xf32>
    %101 = arith.mulf %85, %93 : vector<8x128xf32>
    %102 = arith.addf %100, %101 : vector<8x128xf32>
    %103 = math.tanh %102 : vector<8x128xf32>
    %104 = arith.mulf %99, %103 : vector<8x128xf32>
    %c3_i32 = arith.constant 3 : i32
    %105 = arith.index_cast %c3_i32 : i32 to index
    %c0_35 = arith.constant 0 : index
    %c0_36 = arith.constant 0 : index
    %106 = vector.load %arg9[%105, %c0_35, %c0_36] : memref<4x8x512xf32, #tpu.memory_space<vmem>>, vector<1x8x512xf32>
    %107 = vector.shape_cast %106 : vector<1x8x512xf32> to vector<8x512xf32>
    %cst_37 = arith.constant dense<0.000000e+00> : vector<8x512xf32>
    %108 = tpu.matmul %104, %12, %cst_37 {dimension_numbers = #tpu.dot_dimension_numbers<[1], [0], [0], [1], [0, 0, 1, 1], [], []>} : vector<8x128xf32>, vector<128x512xf32>, vector<8x512xf32> -> vector<8x512xf32>
    %109 = arith.addf %107, %108 : vector<8x512xf32>
    %110 = vector.extract_strided_slice %109 {offsets = [0, 0], sizes = [8, 128], strides = [1, 1]} : vector<8x512xf32> to vector<8x128xf32>
    %111 = arith.negf %110 : vector<8x128xf32>
    %112 = math.exp %111 : vector<8x128xf32>
    %cst_38 = arith.constant 1.000000e+00 : f32
    %113 = vector.broadcast %cst_38 : f32 to vector<8x128xf32>
    %114 = arith.addf %113, %112 : vector<8x128xf32>
    %115 = arith.divf %113, %114 : vector<8x128xf32>
    %116 = vector.extract_strided_slice %109 {offsets = [0, 128], sizes = [8, 128], strides = [1, 1]} : vector<8x512xf32> to vector<8x128xf32>
    %117 = arith.negf %116 : vector<8x128xf32>
    %118 = math.exp %117 : vector<8x128xf32>
    %cst_39 = arith.constant 1.000000e+00 : f32
    %119 = vector.broadcast %cst_39 : f32 to vector<8x128xf32>
    %120 = arith.addf %119, %118 : vector<8x128xf32>
    %121 = arith.divf %119, %120 : vector<8x128xf32>
    %122 = vector.extract_strided_slice %109 {offsets = [0, 256], sizes = [8, 128], strides = [1, 1]} : vector<8x512xf32> to vector<8x128xf32>
    %123 = math.tanh %122 : vector<8x128xf32>
    %124 = vector.extract_strided_slice %109 {offsets = [0, 384], sizes = [8, 128], strides = [1, 1]} : vector<8x512xf32> to vector<8x128xf32>
    %125 = arith.negf %124 : vector<8x128xf32>
    %126 = math.exp %125 : vector<8x128xf32>
    %cst_40 = arith.constant 1.000000e+00 : f32
    %127 = vector.broadcast %cst_40 : f32 to vector<8x128xf32>
    %128 = arith.addf %127, %126 : vector<8x128xf32>
    %129 = arith.divf %127, %128 : vector<8x128xf32>
    %130 = arith.mulf %121, %102 : vector<8x128xf32>
    %131 = arith.mulf %115, %123 : vector<8x128xf32>
    %132 = arith.addf %130, %131 : vector<8x128xf32>
    %133 = math.tanh %132 : vector<8x128xf32>
    %134 = arith.mulf %129, %133 : vector<8x128xf32>
    %c4_i32 = arith.constant 4 : i32
    %c0_41 = arith.constant 0 : index
    %c0_42 = arith.constant 0 : index
    %135 = vector.load %arg10[%c0_41, %c0_42] : memref<8x128xf32, #tpu.memory_space<vmem>>, vector<8x128xf32>
    tpu.vector_store %arg10[%c0_41, %c0_42], %134 {strides = array<i32>} : memref<8x128xf32, #tpu.memory_space<vmem>>, vector<8x128xf32>,
    %c0_43 = arith.constant 0 : index
    %c0_44 = arith.constant 0 : index
    %136 = vector.load %arg11[%c0_43, %c0_44] : memref<8x128xf32, #tpu.memory_space<vmem>>, vector<8x128xf32>
    tpu.vector_store %arg11[%c0_43, %c0_44], %132 {strides = array<i32>} : memref<8x128xf32, #tpu.memory_space<vmem>>, vector<8x128xf32>,
    %c1_i32_45 = arith.constant 1 : i32
    %137 = arith.cmpi eq, %arg1, %c1_i32_45 : i32
    %138 = arith.extui %137 : i1 to i32
    %c0_i32_46 = arith.constant 0 : i32
    %139 = arith.cmpi ne, %138, %c0_i32_46 : i32
    scf.if %139 {
      %c0_47 = arith.constant 0 : index
      %c0_48 = arith.constant 0 : index
      %140 = vector.load %arg6[%c0_47, %c0_48] : memref<128x128xf32, #tpu.memory_space<vmem>>, vector<128x128xf32>
      %cst_49 = arith.constant dense<0.000000e+00> : vector<8x128xf32>
      %141 = tpu.matmul %134, %140, %cst_49 {dimension_numbers = #tpu.dot_dimension_numbers<[1], [0], [0], [1], [0, 0, 1, 1], [], []>} : vector<8x128xf32>, vector<128x128xf32>, vector<8x128xf32> -> vector<8x128xf32>
      %c0_50 = arith.constant 0 : index
      %c0_51 = arith.constant 0 : index
      %142 = vector.load %arg7[%c0_50, %c0_51] : memref<1x128xf32, #tpu.memory_space<vmem>>, vector<1x128xf32>
      %143 = vector.broadcast %142 : vector<1x128xf32> to vector<8x128xf32>
      %144 = arith.addf %141, %143 : vector<8x128xf32>
      %c0_52 = arith.constant 0 : index
      %c0_53 = arith.constant 0 : index
      %145 = vector.load %arg8[%c0_52, %c0_53] : memref<8x128xf32, #tpu.memory_space<vmem>>, vector<8x128xf32>
      tpu.vector_store %arg8[%c0_52, %c0_53], %144 {strides = array<i32>} : memref<8x128xf32, #tpu.memory_space<vmem>>, vector<8x128xf32>,
    } else {
    }
    return
  }
  func.func @transform_0(%arg0: i32, %arg1: i32) -> (i32, i32, i32) {
    %c0_i32 = arith.constant 0 : i32
    %c0_i32_0 = arith.constant 0 : i32
    return %arg1, %arg0, %c0_i32 : i32, i32, i32
  }
  func.func @transform_1(%arg0: i32, %arg1: i32) -> (i32, i32) {
    %c0_i32 = arith.constant 0 : i32
    %c0_i32_0 = arith.constant 0 : i32
    %c0_i32_1 = arith.constant 0 : i32
    return %c0_i32, %c0_i32_0 : i32, i32
  }
  func.func @transform_2(%arg0: i32, %arg1: i32) -> (i32, i32) {
    %c0_i32 = arith.constant 0 : i32
    %c0_i32_0 = arith.constant 0 : i32
    %c0_i32_1 = arith.constant 0 : i32
    return %c0_i32, %c0_i32_0 : i32, i32
  }
  func.func @transform_3(%arg0: i32, %arg1: i32) -> (i32, i32) {
    %c0_i32 = arith.constant 0 : i32
    %c0_i32_0 = arith.constant 0 : i32
    %c0_i32_1 = arith.constant 0 : i32
    return %c0_i32, %c0_i32_0 : i32, i32
  }
  func.func @transform_4(%arg0: i32, %arg1: i32) -> (i32, i32) {
    %c0_i32 = arith.constant 0 : i32
    %c0_i32_0 = arith.constant 0 : i32
    %c0_i32_1 = arith.constant 0 : i32
    return %c0_i32, %c0_i32_0 : i32, i32
  }
  func.func @transform_5(%arg0: i32, %arg1: i32) -> (i32, i32) {
    %c0_i32 = arith.constant 0 : i32
    %c0_i32_0 = arith.constant 0 : i32
    %c0_i32_1 = arith.constant 0 : i32
    return %c0_i32, %c0_i32_0 : i32, i32
  }
  func.func @transform_6(%arg0: i32, %arg1: i32) -> (i32, i32) {
    %c0_i32 = arith.constant 0 : i32
    %c0_i32_0 = arith.constant 0 : i32
    return %arg0, %c0_i32 : i32, i32
  }
}

</mosaic_0001>

<bundles_post_ra>
// kernel: tpu_custom_call.1
= control target key start
LH: loop header
LB: loop body
LE: loop exit
PB: predicated region body
PF: predicated region fallthrough
CT: control target
= control target key end

     0   :  { %11 = vsyncpa [#allocation6], 0  ;;  %s2801_s0 = inlined_call_operand.hbm [shape: bf16[8,8,16], index: 0, kind: input, shape index: {}]   ;;  %s2802_s1 = inlined_call_operand.hbm [shape: bf16[16,512], index: 1, kind: input, shape index: {}]   ;;  %s2803_s2 = inlined_call_operand.hbm [shape: f32[128,512], index: 2, kind: input, shape index: {}]   ;;  %s2804_s3 = inlined_call_operand.vmem [shape: f32[1,512], index: 3, kind: input, shape index: {}]   ;;  %s2805_s4 = inlined_call_operand.hbm [shape: f32[128,128], index: 4, kind: input, shape index: {}]   ;;  %s2806_s5 = inlined_call_operand.vmem [shape: f32[1,128], index: 5, kind: input, shape index: {}]   ;;  %s2807_s6 = inlined_call_operand.hbm [shape: f32[8,128], index: 6, kind: output, shape index: {}]  }
   0x1   :  { %13 = vsyncpa [#allocation6 + $0x1], 0 }
   0x2   :  { %14 = vsyncpa [#allocation9], 0 }
   0x3   :  { %15 = vsyncpa [#allocation12], 0 }
   0x4   :  { %16 = vsyncpa [#allocation7], 0  ;;  %s2298_s21 = smov 0   ;;  %s2300_s22 = smov 0  }
   0x5   :  { %s2302_s23 = smov 0   ;;  %s2304_s24 = smov 0  }
   0x6   :  { %s2306_s25 = smov 0   ;;  %s2308_s26 = smov 0  }
   0x7 LB: > { %s2812_s27 = sadd.s32 4294967295, %s2242_s26   ;;  %p56_p0 = scmp.ne.s32.totalorder %s2226_s22, %s2222_s21  ;;  %s2242_s26 = sphi %s2308_s26, %s22_s26   ;;  %s2238_s25 = sphi %s2306_s25, %s2843_s25   ;;  %s2234_s24 = sphi %s2304_s24, %s2842_s24   ;;  %s2230_s23 = sphi %s2302_s23, %s2841_s23   ;;  %s2226_s22 = sphi %s2300_s22, %s2840_s22   ;;  %s2222_s21 = sphi %s2298_s21, %s2839_s21  }
   0x8   : > { %p2330_p1 = scmp.eq.s32.totalorder %s2812_s27, 0  ;;  %p1486_p2 = scmp.ge.s32.totalorder %s2242_s26, 1 }
   0x9   : > { %p198_p3 = scmp.lt.s32.totalorder %s2242_s26, 3  ;;  %s2244_s7 = smov [#allocation8]  }
   0xa   : > { %s2815_s28 = scalar_select %p2330_p1, 1, 0 }
   0xb   : > { %p2338_p4 = por %p2330_p1, %p56_p0  ;;  %p2342_p5 = pnand %p1486_p2, %p198_p3 }
   0xc   : > { %s210_s8 = sshll.u32 %s2244_s7, 4  ;;  %s2245_s10 = smov [#allocation10]   ;;  %s211_s8 = int_to_ptr.vmem [resolvable:$true] %s210_s8 }
   0xd   : > { %s2816_s29 = scalar_select %p2338_p4, 1, 0 }
   0xe   : > { %s2817_s30 = scalar_select %p2342_p5, 1, 0 }
   0xf   : > { %p1879_p6 = pneg %p2342_p5  ;;  %s223_s11 = sshll.u32 %s2245_s10, 4  ;;  %s2354_s11 = int_to_ptr.vmem [resolvable:$true] %s223_s11 }
  0x10   : > { %s2040_s14 = scalar_lea.hbm %s2802_s1, 512 }
  0x11   : > { %p2350_p7 = pnand %p1879_p6, %p2330_p1  ;;  %p2041_p8 = scmp.ne.s32.totalorder %s2802_s1, %s2040_s14 }
  0x12   : > { %p2047_p12 = scmp.lt.u32.totalorder %s2040_s14, %s2802_s1 }
  0x13   : > { %p2364_p9 = pneg %p2350_p7 }
  0x15   : > { %p2043_p10 = pnand %p2364_p9, %p2041_p8 }
  0x17   : > { %p2044_p11 = pneg %p2043_p10 }
  0x19   : > { %p2049_p13 = pnand %p2047_p12, %p2044_p11 }
  0x1b   : > { %2052 = shalt.err (!%p2049_p13)
}
  0x1c   : > { %s2053_s20 = scalar_lea.vmem %s211_s8, 512  ;;  %p2061_p6 = scmp.lt.s32.totalorder %s211_s8, %s211_s8 }
  0x1d   : > { %p2054_p0 = scmp.ne.s32.totalorder %s211_s8, %s2053_s20  ;;  %p2062_p1 = scmp.lt.s32.totalorder %s2053_s20, %s2053_s20 }
  0x1f   : > { %p2056_p2 = pnand %p2054_p0, %p2364_p9  ;;  %p2063_p4 = por %p2062_p1, %p2061_p6 }
  0x21   : > { %p2057_p3 = pneg %p2056_p2 }
  0x23   : > { %p2064_p5 = pnand %p2063_p4, %p2057_p3 }
  0x25   : > { %2067 = shalt.err (!%p2064_p5)
}
  0x26   : > { %s2246_s21 = smov 256   ;;  %s2247_s7 = smov 16  }
  0x27   : > { %1882 = dma.hbm_to_vmem [thread:$0]  (!%p2350_p7), %s2802_s1, 512, %s211_s8, [#allocation9], %s2246_s21, %s2246_s21, %s2247_s7  }
  0x28   : > { %s2068_s15 = scalar_lea.hbm %s2803_s2, 8192 }
  0x29   : > { %p2069_p8 = scmp.ne.s32.totalorder %s2803_s2, %s2068_s15  ;;  %p2075_p5 = scmp.lt.u32.totalorder %s2068_s15, %s2803_s2 }
  0x2b   : > { %p2071_p1 = pnand %p2069_p8, %p2364_p9 }
  0x2d   : > { %p2072_p4 = pneg %p2071_p1 }
  0x2f   : > { %p2077_p10 = pnand %p2075_p5, %p2072_p4 }
  0x31   : > { %2080 = shalt.err (!%p2077_p10)
}
  0x32   : > { %s2081_s8 = scalar_lea.vmem %s2354_s11, 8192  ;;  %p2089_p0 = scmp.lt.s32.totalorder %s2354_s11, %s2354_s11 }
  0x33   : > { %p2082_p11 = scmp.ne.s32.totalorder %s2354_s11, %s2081_s8  ;;  %p2090_p2 = scmp.lt.s32.totalorder %s2081_s8, %s2081_s8 }
  0x35   : > { %p2084_p12 = pnand %p2082_p11, %p2364_p9  ;;  %p2091_p3 = por %p2090_p2, %p2089_p0 }
  0x37   : > { %p2085_p13 = pneg %p2084_p12 }
  0x39   : > { %p2092_p6 = pnand %p2091_p3, %p2085_p13 }
  0x3b   : > { %2095 = shalt.err (!%p2092_p6)
}
  0x3c   : > { %s2248_s21 = smov 512   ;;  %s2249_s7 = smov 32  }
  0x3d   : > { %1885 = dma.hbm_to_vmem [thread:$0]  (!%p2350_p7), %s2803_s2, 8192, %s2354_s11, [#allocation9], %s2248_s21, %s2248_s21, %s2249_s7  }
  0x3e   : > { %s2250_s13 = smov [#allocation11]   ;;  %s2096_s18 = scalar_lea.hbm %s2805_s4, 2048 }
  0x3f   : > { %s239_s14 = sshll.u32 %s2250_s13, 4  ;;  %p2097_p8 = scmp.ne.s32.totalorder %s2805_s4, %s2096_s18  ;;  %s240_s14 = int_to_ptr.vmem [resolvable:$true] %s239_s14 }
  0x40   : > { %p2103_p5 = scmp.lt.u32.totalorder %s2096_s18, %s2805_s4 }
  0x41   : > { %p2099_p1 = pnand %p2097_p8, %p2364_p9 }
  0x43   : > { %p2100_p4 = pneg %p2099_p1 }
  0x45   : > { %p2105_p10 = pnand %p2103_p5, %p2100_p4 }
  0x47   : > { %2108 = shalt.err (!%p2105_p10)
}
  0x48   : > { %s2109_s11 = scalar_lea.vmem %s240_s14, 2048  ;;  %p2117_p0 = scmp.lt.s32.totalorder %s240_s14, %s240_s14 }
  0x49   : > { %p2110_p11 = scmp.ne.s32.totalorder %s240_s14, %s2109_s11  ;;  %p2118_p2 = scmp.lt.s32.totalorder %s2109_s11, %s2109_s11 }
  0x4b   : > { %p2112_p12 = pnand %p2110_p11, %p2364_p9  ;;  %p2119_p3 = por %p2118_p2, %p2117_p0 }
  0x4d   : > { %p2113_p13 = pneg %p2112_p12 }
  0x4f   : > { %p2120_p6 = pnand %p2119_p3, %p2113_p13 }
  0x51   : > { %2123 = shalt.err (!%p2120_p6)
}
  0x52   : > { %s2251_s21 = smov 128   ;;  %s2252_s27 = smov 8  }
  0x53   : > { %1888 = dma.hbm_to_vmem [thread:$0]  (!%p2350_p7), %s2805_s4, 2048, %s240_s14, [#allocation12], %s2251_s21, %s2251_s21, %s2252_s27  }
  0x54   : > { %s43_s10 = sadd.s32 1, %s2230_s23  ;;  %s31_s12 = sadd.s32 1, %s2238_s25 }
  0x55   : > { %p50_p9 = scmp.ne.s32.totalorder %s2230_s23, %s2226_s22  ;;  %p32_p8 = scmp.ge.s32.totalorder %s31_s12, 2 }
  0x56   : > { %p51_p1 = scmp.eq.s32.totalorder %s2242_s26, 0  ;;  %p1896_p4 = scmp.lt.s32.totalorder %s2242_s26, 2 }
  0x57   : > { %s256_s13 = sand.u32 1, %s2230_s23   ;;  %s2845_s12 = smov (%p32_p8, %s31_s12), 0 }
  0x58   : > { %p52_p5 = por %p51_p1, %p50_p9  ;;  %s38_s15 = ssub.s32 %s2238_s25, %s2845_s12 }
  0x59   : > { %s1491_s16 = sshll.u32 %s256_s13, 4  ;;  %p41_p10 = scmp.eq.s32.totalorder %s38_s15, 0 }
  0x5a   : > { %s1528_s9 = sshll.u32 %s2238_s25, 8  ;;  %s260_s18 = scalar_lea.vmem [#allocation5], %s1491_s16 }
  0x5b   : > { %s268_s19 = sshll.u32 %s260_s18, 4  ;;  %s2439_s11 = scalar_lea.hbm %s2801_s0, %s1528_s9  ;;  %s2441_s19 = int_to_ptr.vmem [resolvable:$true] %s268_s19 }
  0x5c   : > { %s2434_s14 = scalar_select %p41_p10, %s2230_s23, %s43_s10  }
  0x5d   : > { %p2445_p7 = pnand %p1896_p4, %p52_p5  ;;  %s2449_s27 = scalar_lea.sflag [#allocation6], %s256_s13 }
  0x5e   : > { %s2124_s17 = scalar_lea.hbm %s2439_s11, 256  ;;  %s2129_s15 = scalar_lea.hbm %s2801_s0, 512 }
  0x5f   : > { %p2125_p11 = scmp.ne.s32.totalorder %s2439_s11, %s2124_s17  ;;  %p2126_p12 = pneg %p2445_p7 }
  0x60   : > { %p2130_p2 = scmp.lt.u32.totalorder %s2439_s11, %s2801_s0  ;;  %p2131_p3 = scmp.lt.u32.totalorder %s2129_s15, %s2124_s17 }
  0x61   : > { %p2127_p13 = pnand %p2126_p12, %p2125_p11  ;;  %p2133_p9 = scmp.lt.u32.totalorder %s2124_s17, %s2439_s11 }
  0x62   : > { %p2132_p6 = por %p2131_p3, %p2130_p2 }
  0x63   : > { %p2128_p0 = pneg %p2127_p13 }
  0x64   : > { %p2134_p8 = por %p2133_p9, %p2132_p6 }
  0x66   : > { %p2135_p1 = pnand %p2134_p8, %p2128_p0 }
  0x68   : > { %2138 = shalt.err (!%p2135_p1)
}
  0x69   : > { %s2139_s13 = scalar_lea.vmem %s2441_s19, 256  ;;  %s2253_s18 = smov [#allocation5]  }
  0x6a   : > { %p2140_p4 = scmp.ne.s32.totalorder %s2441_s19, %s2139_s13  ;;  %s2144_s20 = sshll.u32 %s2253_s18, 4  ;;  %s2145_s20 = int_to_ptr.vmem [resolvable:$false] %s2144_s20 }
  0x6b   : > { %s2146_s8 = scalar_lea.vmem %s2145_s20, 512  ;;  %p2147_p11 = scmp.lt.s32.totalorder %s2441_s19, %s2145_s20 }
  0x6c   : > { %p2142_p5 = pnand %p2140_p4, %p2126_p12  ;;  %p2148_p13 = scmp.lt.s32.totalorder %s2146_s8, %s2139_s13 }
  0x6e   : > { %p2143_p10 = pneg %p2142_p5  ;;  %p2149_p2 = por %p2148_p13, %p2147_p11 }
  0x70   : > { %p2150_p3 = pnand %p2149_p2, %p2143_p10 }
  0x72   : > { %2153 = shalt.err (!%p2150_p3)
}
  0x73   : > { %s2254_s17 = smov 64   ;;  %s2255_s7 = smov 4  }
  0x74   : > { %1892 = dma.hbm_to_vmem [thread:$0]  (!%p2445_p7), %s2439_s11, 256, %s2441_s19, %s2449_s27, %s2254_s17, %s2254_s17, %s2255_s7  }
  0x75   : > { %p2821_p12 = scmp.ne.s32.totalorder %s2817_s30, 0 }
  0x77   : > { %280 = sbr.rel (%p2821_p12) target bundleno = 1455 (0x5af), region = 44 }
  0x7e   : > { %s282_s10 = sand.u32 1, %s2226_s22   ;;  %p2822_p0 = scmp.ne.s32.totalorder %s2816_s29, 0 }
  0x7f   : > { %s2480_s15 = sshll.u32 %s282_s10, 4  ;;  %s283_s16 = scalar_lea.sflag [#allocation6], %s282_s10 }
  0x80   : > { %s286_s9 = scalar_lea.vmem [#allocation5], %s2480_s15 }
  0x81   : > { %2205 = dma.done.wait (%p2822_p0), %s283_s16, 256  }
  0x82   : > { %2207 = vsyncadd (%p2822_p0), %s283_s16, 4294967040  ;;  %p2823_p6 = scmp.ne.s32.totalorder %s2815_s28, 0 }
  0x84   : > { %2209 = dma.done.wait (%p2823_p6), [#allocation9], 8704  }
  0x85   : > { %2211 = vsyncadd (%p2823_p6), [#allocation9], 4294958592 }
  0x86   : > { %2213 = dma.done.wait (%p2823_p6), [#allocation12], 2048  }
  0x87   : > { %2215 = vsyncadd (%p2823_p6), [#allocation12], 4294965248  ;;  %p1499_p7 = scmp.ne.s32.totalorder %s2234_s24, 0 }
  0x88   : > { %v2256_v0 = vmov (!%p1499_p7), 0.0  }
  0x89   : > { %327 = sbr.rel (%p1499_p7) target bundleno = 144 (0x90), region = 64  ;;  %328 = vst [vmem:[#allocation3] sm:$0xff] (!%p1499_p7), %v2256_v0  ;;  %329 = vst [vmem:[#allocation4] sm:$0xff] (!%p1499_p7), %v2256_v0 }
  0x90 PF: > { %v1968_v1 = vld [vmem:[#allocation8 + $0x4] ss:$16 sps:$4 sm:$0xff]   ;;  %v1970_v2 = vld [vmem:[#allocation8 + $0xc] ss:$16 sps:$4 sm:$0xff]   ;;  %v2257_v3 = vmov 0   ;;  %vm390_vm0 = vcmask 130048  }
  0x91   : > { %429 = vmatprep.mubr.bf16.mxu0 %v2257_v3  ;;  %482 = vmatprep.mubr.bf16.mxu1 %v2257_v3  ;;  %v1972_v4 = vld [vmem:[#allocation8] ss:$16 sps:$4 sm:$0xff]   ;;  %v1973_v5 = vld [vmem:[#allocation8 + $0x8] ss:$16 sps:$4 sm:$0xff]   ;;  %p1522_p9 = scmp.ne.s32.totalorder %s2234_s24, 1 }
  0x92   : > { %397 = vmatprep.subr.bf16.mxu0 %v1968_v1  ;;  %450 = vmatprep.subr.bf16.mxu1 %v1970_v2  ;;  %v1974_v6 = vld [vmem:[%s286_s9] sm:$0xff]   ;;  %v520_v7 = vld [vmem:[#allocation10 + $0x8] sm:$0xff]  ;;  %v522_v9 = vld [vmem:[#allocation10 + $0x18] sm:$0xff]  ;;  %vm2260_vm1 = vmmov (!%p1522_p9), 0  }
  0x93   : > { %398 = vmatpush1.bf16.msra.mxu0 %v1972_v4  ;;  %451 = vmatpush1.bf16.msra.mxu1 %v1973_v5  ;;  %v524_v8 = vld [vmem:[#allocation10 + $0x28] sm:$0xff]  ;;  %v526_v10 = vld [vmem:[#allocation10 + $0x38] sm:$0xff]  ;;  %v519_v13 = vld [vmem:[#allocation10] sm:$0xff] }
  0x94   : > { %v2498_v11 = vpack.c.bf16 %v524_v8, %v520_v7  ;;  %v2500_v12 = vpack.c.bf16 %v526_v10, %v522_v9  ;;  %v523_v14 = vld [vmem:[#allocation10 + $0x20] sm:$0xff]  ;;  %v521_v15 = vld [vmem:[#allocation10 + $0x10] sm:$0xff]  ;;  %v528_v18 = vld [vmem:[#allocation10 + $0x48] sm:$0xff] }
  0x95   : > { %v2502_v16 = vpack.c.bf16 %v523_v14, %v519_v13  ;;  %v525_v17 = vld [vmem:[#allocation10 + $0x30] sm:$0xff]  ;;  %v532_v19 = vld [vmem:[#allocation10 + $0x68] sm:$0xff]  ;;  %v530_v22 = vld [vmem:[#allocation10 + $0x58] sm:$0xff] }
  0x96   : > { %1506 = vmatmul.mubr.msk.bf16.vlgmr.msra.gmra.mrb[0].mxu0 %vm390_vm0, %v1974_v6  ;;  %1582 = vmatprep.subr.bf16.mxu0 %v2498_v11  ;;  %v2506_v20 = vpack.c.bf16 %v525_v17, %v521_v15  ;;  %v2508_v21 = vpack.c.bf16 %v532_v19, %v528_v18  ;;  %v534_v23 = vld [vmem:[#allocation10 + $0x78] sm:$0xff]  ;;  %v527_v24 = vld [vmem:[#allocation10 + $0x40] sm:$0xff]  ;;  %v529_v27 = vld [vmem:[#allocation10 + $0x50] sm:$0xff] }
  0x97   : > { %1614 = vmatprep.subr.bf16.mxu1 %v2500_v12  ;;  %1508 = vmatmul.mubr.msk.bf16.vlgmr.msra.gmra.mrb[0].mxu1 %vm390_vm0, %v1974_v6  ;;  %v2512_v25 = vpack.c.bf16 %v534_v23, %v530_v22  ;;  %v531_v26 = vld [vmem:[#allocation10 + $0x60] sm:$0xff]  ;;  %v533_v28 = vld [vmem:[#allocation10 + $0x70] sm:$0xff]  ;;  %v536_v31 = vld [vmem:[#allocation10 + $0x88] sm:$0xff]  ;;  %v2813_v23 = vmov 0.0  }
  0x98   : > { %1584 = vmatpush1.bf16.msra.mxu0 %v2502_v16  ;;  %1616 = vmatpush1.bf16.msra.mxu1 %v2506_v20  ;;  %v2516_v29 = vpack.c.bf16 %v531_v26, %v527_v24  ;;  %v2518_v30 = vpack.c.bf16 %v533_v28, %v529_v27  ;;  %v540_v32 = vld [vmem:[#allocation10 + $0xa8] sm:$0xff]  ;;  %v538_v33 = vld [vmem:[#allocation10 + $0x98] sm:$0xff]  ;;  %v535_v36 = vld [vmem:[#allocation10 + $0x80] sm:$0xff] }
  0x99   : > { %1586 = vmatprep.subr.bf16.mxu0 %v2508_v21  ;;  %1618 = vmatprep.subr.bf16.mxu1 %v2512_v25  ;;  %v2522_v34 = vpack.c.bf16 %v540_v32, %v536_v31  ;;  %v542_v35 = vld [vmem:[#allocation10 + $0xb8] sm:$0xff]  ;;  %v539_v37 = vld [vmem:[#allocation10 + $0xa0] sm:$0xff]  ;;  %v537_v39 = vld [vmem:[#allocation10 + $0x90] sm:$0xff] }
  0x9a   : > { %v2524_v38 = vpack.c.bf16 %v542_v35, %v538_v33  ;;  %v541_v40 = vld [vmem:[#allocation10 + $0xb0] sm:$0xff]  ;;  %v544_v41 = vld [vmem:[#allocation10 + $0xc8] sm:$0xff]  ;;  %439 = vmatprep.mubr.bf16.mxu0 %v2257_v3  ;;  %492 = vmatprep.mubr.bf16.mxu1 %v2257_v3  ;;  %v546_v43 = vld [vmem:[#allocation10 + $0xd8] sm:$0xff]  ;;  %v2528_v45 = vpack.c.bf16 %v539_v37, %v535_v36 }
  0x9b   : > { %v548_v42 = vld [vmem:[#allocation10 + $0xe8] sm:$0xff]  ;;  %v550_v44 = vld [vmem:[#allocation10 + $0xf8] sm:$0xff]  ;;  %v2530_v46 = vpack.c.bf16 %v541_v40, %v537_v39  ;;  %v543_v47 = vld [vmem:[#allocation10 + $0xc0] sm:$0xff] }
  0x9c   : > { %1588 = vmatpush1.bf16.msra.mxu0 %v2516_v29  ;;  %1620 = vmatpush1.bf16.msra.mxu1 %v2518_v30  ;;  %v547_v48 = vld [vmem:[#allocation10 + $0xe0] sm:$0xff]  ;;  %v2534_v49 = vpack.c.bf16 %v548_v42, %v544_v41  ;;  %v2536_v50 = vpack.c.bf16 %v550_v44, %v546_v43  ;;  %v545_v51 = vld [vmem:[#allocation10 + $0xd0] sm:$0xff]  ;;  %v552_v53 = vld [vmem:[#allocation10 + $0x108] sm:$0xff] }
  0x9d   : > { %1590 = vmatprep.subr.bf16.mxu0 %v2522_v34  ;;  %1622 = vmatprep.subr.bf16.mxu1 %v2524_v38  ;;  %v549_v52 = vld [vmem:[#allocation10 + $0xf0] sm:$0xff]  ;;  %v556_v54 = vld [vmem:[#allocation10 + $0x128] sm:$0xff]  ;;  %v554_v55 = vld [vmem:[#allocation10 + $0x118] sm:$0xff]  ;;  %v2540_v59 = vpack.c.bf16 %v547_v48, %v543_v47 }
  0x9e   : > { %v558_v56 = vld [vmem:[#allocation10 + $0x138] sm:$0xff]  ;;  %v551_v57 = vld [vmem:[#allocation10 + $0x100] sm:$0xff]  ;;  %v2542_v60 = vpack.c.bf16 %v549_v52, %v545_v51  ;;  %v553_v61 = vld [vmem:[#allocation10 + $0x110] sm:$0xff]  ;;  %v2546_v0 = vpack.c.bf16 %v556_v54, %v552_v53 }
  0x9f   : > { %v555_v58 = vld [vmem:[#allocation10 + $0x120] sm:$0xff]  ;;  %v557_v62 = vld [vmem:[#allocation10 + $0x130] sm:$0xff]  ;;  %v560_v63 = vld [vmem:[#allocation10 + $0x148] sm:$0xff]  ;;  %v2548_v1 = vpack.c.bf16 %v558_v56, %v554_v55  ;;  %v340_v56 = vlaneseq }
  0xa0   : > { %1592 = vmatpush1.bf16.msra.mxu0 %v2528_v45  ;;  %1624 = vmatpush1.bf16.msra.mxu1 %v2530_v46  ;;  %v564_v2 = vld [vmem:[#allocation10 + $0x168] sm:$0xff]  ;;  %v562_v3 = vld [vmem:[#allocation10 + $0x158] sm:$0xff]  ;;  %v2554_v6 = vpack.c.bf16 %v555_v58, %v551_v57  ;;  %v2556_v7 = vpack.c.bf16 %v557_v62, %v553_v61  ;;  %v559_v8 = vld [vmem:[#allocation10 + $0x140] sm:$0xff] }
  0xa1   : > { %1594 = vmatprep.subr.bf16.mxu0 %v2534_v49  ;;  %1626 = vmatprep.subr.bf16.mxu1 %v2536_v50  ;;  %v566_v4 = vld [vmem:[#allocation10 + $0x178] sm:$0xff]  ;;  %v563_v9 = vld [vmem:[#allocation10 + $0x160] sm:$0xff]  ;;  %v2560_v10 = vpack.c.bf16 %v564_v2, %v560_v63  ;;  %v561_v14 = vld [vmem:[#allocation10 + $0x150] sm:$0xff]  ;;  %v341_v57 = vshrl.u32 %v340_v56, 7 }
  0xa2   : > { %v1975_v5 = vld [vmem:[%s286_s9 + $0x8] sm:$0xff]   ;;  %v2562_v13 = vpack.c.bf16 %v566_v4, %v562_v3  ;;  %v565_v15 = vld [vmem:[#allocation10 + $0x170] sm:$0xff]  ;;  %v2570_v24 = vpack.c.bf16 %v563_v9, %v559_v8  ;;  %v567_v27 = vld [vmem:[#allocation10 + $0x180] sm:$0xff] }
  0xa3   : > { %v568_v17 = vld [vmem:[#allocation10 + $0x188] sm:$0xff]  ;;  %1507 = vmatmul.mubr.msk.bf16.gmra.mrb[4].mxu0 %vm390_vm0, %v1975_v5  ;;  %1509 = vmatmul.mubr.msk.bf16.gmra.mrb[4].mxu1 %vm390_vm0, %v1975_v5  ;;  %v570_v19 = vld [vmem:[#allocation10 + $0x198] sm:$0xff]  ;;  %v2572_v26 = vpack.c.bf16 %v565_v15, %v561_v14  ;;  %v571_v28 = vld [vmem:[#allocation10 + $0x1a0] sm:$0xff]  ;;  %v342_v58 = vsub.s32 0, %v341_v57  ;;  %v350_v62 = vsub.s32 2, %v341_v57  ;;  %v354_v63 = vsub.s32 3, %v341_v57 }
  0xa4   : > { %1596 = vmatpush1.bf16.msra.mxu0 %v2540_v59  ;;  %1628 = vmatpush1.bf16.msra.mxu1 %v2542_v60  ;;  %v572_v18 = vld [vmem:[#allocation10 + $0x1a8] sm:$0xff]  ;;  %v574_v22 = vld [vmem:[#allocation10 + $0x1b8] sm:$0xff]  ;;  %v569_v33 = vld [vmem:[#allocation10 + $0x190] sm:$0xff]  ;;  %v2582_v41 = vpack.c.bf16 %v571_v28, %v567_v27  ;;  %v346_v2 = vsub.s32 1, %v341_v57 }
  0xa5   : > { %1598 = vmatprep.subr.bf16.mxu0 %v2546_v0  ;;  %1630 = vmatprep.subr.bf16.mxu1 %v2548_v1  ;;  %v2576_v31 = vpack.c.bf16 %v572_v18, %v568_v17  ;;  %v2578_v32 = vpack.c.bf16 %v574_v22, %v570_v19  ;;  %v573_v35 = vld [vmem:[#allocation10 + $0x1b0] sm:$0xff]  ;;  %v576_v36 = vld [vmem:[#allocation10 + $0x1c8] sm:$0xff]  ;;  %v578_v39 = vld [vmem:[#allocation10 + $0x1d8] sm:$0xff] }
  0xa6   : > { %653 = vmatprep.mubr.f32.mxu0 %v2813_v23  ;;  %724 = vmatprep.mubr.f32.mxu1 %v2813_v23  ;;  %v580_v37 = vld [vmem:[#allocation10 + $0x1e8] sm:$0xff]  ;;  %v582_v40 = vld [vmem:[#allocation10 + $0x1f8] sm:$0xff]  ;;  %v2584_v42 = vpack.c.bf16 %v573_v35, %v569_v33  ;;  %v575_v43 = vld [vmem:[#allocation10 + $0x1c0] sm:$0xff] }
  0xa7   : > { %v2588_v44 = vpack.c.bf16 %v580_v37, %v576_v36  ;;  %v2590_v47 = vpack.c.bf16 %v582_v40, %v578_v39  ;;  %v579_v48 = vld [vmem:[#allocation10 + $0x1e0] sm:$0xff]  ;;  %v577_v51 = vld [vmem:[#allocation10 + $0x1d0] sm:$0xff] }
  0xa8   : > { %1600 = vmatpush1.bf16.msra.mxu0 %v2554_v6  ;;  %1632 = vmatpush1.bf16.msra.mxu1 %v2556_v7  ;;  %v581_v52 = vld [vmem:[#allocation10 + $0x1f0] sm:$0xff]  ;;  %v2594_v53 = vpack.c.bf16 %v579_v48, %v575_v43 }
  0xa9   : > { %1602 = vmatprep.subr.bf16.mxu0 %v2560_v10  ;;  %1634 = vmatprep.subr.bf16.mxu1 %v2562_v13  ;;  %v2596_v54 = vpack.c.bf16 %v581_v52, %v577_v51  ;;  %v583_v55 = vld [vmem:[#allocation3] sm:$0xff] }
  0xaa   : > { %v338_v61 = vld [vmem:[%s2804_s3] sm:$0xf] }
  0xab   : > { %v343_v3 = vrot.slane %v338_v61, %v342_v58  ;;  %v351_v5 = vrot.slane %v338_v61, %v350_v62  ;;  %v355_v14 = vrot.slane %v338_v61, %v354_v63  ;;  %v347_v15 = vrot.slane %v338_v61, %v346_v2 }
  0xac   : > { %1604 = vmatpush1.bf16.msra.mxu0 %v2570_v24  ;;  %1636 = vmatpush1.bf16.msra.mxu1 %v2572_v26 }
  0xad   : > { %1606 = vmatprep.subr.bf16.mxu0 %v2576_v31  ;;  %1638 = vmatprep.subr.bf16.mxu1 %v2578_v32 }
  0xb0   : > { %1608 = vmatpush1.bf16.msra.mxu0 %v2582_v41  ;;  %1640 = vmatpush1.bf16.msra.mxu1 %v2584_v42 }
  0xb1   : > { %1610 = vmatprep.subr.bf16.mxu0 %v2588_v44  ;;  %1642 = vmatprep.subr.bf16.mxu1 %v2590_v47 }
  0xb4   : > { %1612 = vmatpush1.bf16.msra.mxu0 %v2594_v53  ;;  %1644 = vmatpush1.bf16.msra.mxu1 %v2596_v54 }
  0xb5   : > { %1646 = vmatprep.subr.bf16.mxu0 %v2498_v11  ;;  %1678 = vmatprep.subr.bf16.mxu1 %v2500_v12 }
  0xb7   : > { %654 = vmatmul.mubr.f32.vlgmr.msra.gmra.mrb[8].mxu0 %v583_v55  ;;  %725 = vmatmul.mubr.f32.vlgmr.msra.gmra.mrb[8].mxu1 %v583_v55 }
  0xb8   : > { %1648 = vmatpush1.bf16.msra.mxu0 %v2502_v16  ;;  %1680 = vmatpush1.bf16.msra.mxu1 %v2506_v20 }
  0xb9   : > { %1650 = vmatprep.subr.bf16.mxu0 %v2508_v21  ;;  %1682 = vmatprep.subr.bf16.mxu1 %v2512_v25 }
  0xba   : > { %828 = vmatprep.mubr.f32.mxu0 %v2813_v23  ;;  %899 = vmatprep.mubr.f32.mxu1 %v2813_v23 }
  0xbc   : > { %1652 = vmatpush1.bf16.msra.mxu0 %v2516_v29  ;;  %1684 = vmatpush1.bf16.msra.mxu1 %v2518_v30 }
  0xbd   : > { %1654 = vmatprep.subr.bf16.mxu0 %v2522_v34  ;;  %1686 = vmatprep.subr.bf16.mxu1 %v2524_v38 }
  0xc0   : > { %1656 = vmatpush1.bf16.msra.mxu0 %v2528_v45  ;;  %1688 = vmatpush1.bf16.msra.mxu1 %v2530_v46 }
  0xc1   : > { %1658 = vmatprep.subr.bf16.mxu0 %v2534_v49  ;;  %1690 = vmatprep.subr.bf16.mxu1 %v2536_v50 }
  0xc4   : > { %1660 = vmatpush1.bf16.msra.mxu0 %v2540_v59  ;;  %1692 = vmatpush1.bf16.msra.mxu1 %v2542_v60 }
  0xc5   : > { %1662 = vmatprep.subr.bf16.mxu0 %v2546_v0  ;;  %1694 = vmatprep.subr.bf16.mxu1 %v2548_v1 }
  0xc8   : > { %1664 = vmatpush1.bf16.msra.mxu0 %v2554_v6  ;;  %1696 = vmatpush1.bf16.msra.mxu1 %v2556_v7 }
  0xc9   : > { %1666 = vmatprep.subr.bf16.mxu0 %v2560_v10  ;;  %1698 = vmatprep.subr.bf16.mxu1 %v2562_v13 }
  0xcc   : > { %1668 = vmatpush1.bf16.msra.mxu0 %v2570_v24  ;;  %1700 = vmatpush1.bf16.msra.mxu1 %v2572_v26 }
  0xcd   : > { %1670 = vmatprep.subr.bf16.mxu0 %v2576_v31  ;;  %1702 = vmatprep.subr.bf16.mxu1 %v2578_v32 }
  0xd0   : > { %1672 = vmatpush1.bf16.msra.mxu0 %v2582_v41  ;;  %1704 = vmatpush1.bf16.msra.mxu1 %v2584_v42 }
  0xd1   : > { %1674 = vmatprep.subr.bf16.mxu0 %v2588_v44  ;;  %1706 = vmatprep.subr.bf16.mxu1 %v2590_v47 }
  0xd4   : > { %1676 = vmatpush1.bf16.msra.mxu0 %v2594_v53  ;;  %1708 = vmatpush1.bf16.msra.mxu1 %v2596_v54 }
  0xd5   : > { %1710 = vmatprep.subr.bf16.mxu0 %v2498_v11  ;;  %1742 = vmatprep.subr.bf16.mxu1 %v2500_v12 }
 0x169   : > { %v431_v4 = vpop.f32.mrb[0].mxu0 }
 0x16a   : > { %v433_v8 = vpop.f32.mrb[1].mxu0  ;;  %v484_v9 = vpop.f32.mrb[0].mxu1 }
 0x16b   : > { %v435_v17 = vpop.f32.mrb[2].mxu0  ;;  %v486_v18 = vpop.f32.mrb[1].mxu1 }
 0x16c   : > { %v2641_v19 = vadd.f32 %v435_v17, %v343_v3  ;;  %v437_v22 = vpop.f32.mrb[3].mxu0  ;;  %v488_v27 = vpop.f32.mrb[2].mxu1 }
 0x16d   : > { %v2643_v28 = vadd.f32 %v437_v22, %v347_v15  ;;  %v2645_v33 = vadd.f32 %v488_v27, %v351_v5  ;;  %v490_v35 = vpop.f32.mrb[3].mxu1  ;;  %v432_v22 = vadd.f32 %v431_v4, %v343_v3  ;;  %v485_v27 = vadd.f32 %v484_v9, %v351_v5 }
 0x16e   : > { %v2647_v36 = vadd.f32 %v490_v35, %v355_v14  ;;  %v434_v35 = vadd.f32 %v433_v8, %v347_v15  ;;  %v584_v8 = vld [vmem:[#allocation4] sm:$0xff] }
 0x176   : > { %v441_v37 = vpop.f32.mrb[4].mxu0  ;;  %v494_v39 = vpop.f32.mrb[4].mxu1 }
 0x177   : > { %v2649_v40 = vadd.f32 %v441_v37, %v343_v3  ;;  %v443_v43 = vpop.f32.mrb[5].mxu0  ;;  %v2651_v48 = vadd.f32 %v494_v39, %v351_v5  ;;  %v496_v51 = vpop.f32.mrb[5].mxu1  ;;  %v487_v37 = vadd.f32 %v486_v18, %v355_v14 }
 0x178   : > { %v2653_v52 = vadd.f32 %v443_v43, %v347_v15  ;;  %v445_v55 = vpop.f32.mrb[6].mxu0  ;;  %v2655_v56 = vadd.f32 %v496_v51, %v355_v14  ;;  %v498_v57 = vpop.f32.mrb[6].mxu1 }
 0x179   : > { %2824 = vst [vmem:[#allocation18_spill] sm:$0xff] %v2651_v48  ;;  %v2657_v58 = vadd.f32 %v445_v55, %v343_v3  ;;  %v447_v61 = vpop.f32.mrb[7].mxu0  ;;  %v2659_v62 = vadd.f32 %v498_v57, %v351_v5  ;;  %v500_v63 = vpop.f32.mrb[7].mxu1 }
 0x17a   : > { %2825 = vst [vmem:[#allocation19_spill] sm:$0xff] %v2653_v52  ;;  %2826 = vst [vmem:[#allocation20_spill] sm:$0xff] %v2655_v56  ;;  %v2661_v2 = vadd.f32 %v447_v61, %v347_v15  ;;  %v2663_v17 = vadd.f32 %v500_v63, %v355_v14 }
 0x17b   : > { %2827 = vst [vmem:[#allocation21_spill] sm:$0xff] %v2657_v58 }
 0x17c   : > { %2828 = vst [vmem:[#allocation22_spill] sm:$0xff] %v2661_v2  ;;  %2829 = vst [vmem:[#allocation23_spill] sm:$0xff] %v2663_v17 }
 0x18a   : > { %v655_v39 = vpop.f32.mrb[8].mxu0  ;;  %v726_v43 = vpop.f32.mrb[8].mxu1 }
 0x18b   : > { %v731_v23 = vadd.f32 %v655_v39, %v432_v22  ;;  %v733_v51 = vadd.f32 %v726_v43, %v485_v27  ;;  %v657_v56 = vpop.f32.mrb[9].mxu0  ;;  %v728_v52 = vpop.f32.mrb[9].mxu1 }
 0x18c   : > { %v732_v55 = vadd.f32 %v657_v56, %v434_v35  ;;  %v734_v58 = vadd.f32 %v728_v52, %v487_v37 }
 0x18d   : > { %v1510_v48 = vmul.f32 -1.442695, %v731_v23 }
 0x18e   : > { %v1511_v57 = vmul.f32 -1.442695, %v732_v55  ;;  %v1512_v61 = vmul.f32 -1.442695, %v734_v58 }
 0x18f   : > { %1976 = vpow2.f32 %v1510_v48 }
 0x190   : > { %1978 = vpow2.f32 %v1511_v57 }
 0x191   : > { %1980 = vpow2.f32 %v1512_v61 }
 0x192   : > { %1982 = vtanh.f32 %v733_v51 }
 0x199   : > { %v1977_v2 = vpop.eup %1976 }
 0x19a   : > { %v1979_v63 = vpop.eup %1978  ;;  %v738_v17 = vadd.f32 1.0, %v1977_v2  ;;  %v2830_v2 = vmov 0.0  }
 0x19b   : > { %v744_v3 = vadd.f32 1.0, %v1979_v63  ;;  %v1981_v4 = vpop.eup %1980 }
 0x19c   : > { %1984 = vrcp.f32 %v738_v17  ;;  %v1983_v5 = vpop.eup %1982  ;;  %v751_v18 = vadd.f32 1.0, %v1981_v4 }
 0x19d   : > { %1986 = vrcp.f32 %v744_v3 }
 0x19e   : > { %1988 = vrcp.f32 %v751_v18 }
 0x1a6   : > { %v1985_v9 = vpop.eup %1984 }
 0x1a7   : > { %v1987_v14 = vpop.eup %1986  ;;  %v755_v15 = vmul.f32 %v1985_v9, %v1983_v5 }
 0x1a8   : > { %v754_v23 = vmul.f32 %v1987_v14, %v584_v8  ;;  %v1989_v48 = vpop.eup %1988 }
 0x1aa   : > { %v2665_v52 = vadd.f32 %v755_v15, %v754_v23  ;;  %v2834_v23 = vld [vmem:[#allocation21_spill] sm:$0xff] }
 0x1ac   : > { %1990 = vtanh.f32 %v2665_v52 }
 0x1b6   : > { %v1991_v56 = vpop.eup %1990 }
 0x1b7   : > { %v758_v58 = vmul.f32 %v1991_v56, %v1989_v48 }
 0x1b9   : > { %829 = vmatmul.mubr.f32.vlgmr.msra.gmra.mrb[10].mxu0 %v758_v58  ;;  %900 = vmatmul.mubr.f32.vlgmr.msra.gmra.mrb[10].mxu1 %v758_v58 }
 0x1ba   : > { %1712 = vmatpush1.bf16.msra.mxu0 %v2502_v16  ;;  %1744 = vmatpush1.bf16.msra.mxu1 %v2506_v20 }
 0x1bb   : > { %1714 = vmatprep.subr.bf16.mxu0 %v2508_v21  ;;  %1746 = vmatprep.subr.bf16.mxu1 %v2512_v25 }
 0x1bc   : > { %1003 = vmatprep.mubr.f32.mxu0 %v2830_v2  ;;  %1074 = vmatprep.mubr.f32.mxu1 %v2830_v2 }
 0x1be   : > { %1716 = vmatpush1.bf16.msra.mxu0 %v2516_v29  ;;  %1748 = vmatpush1.bf16.msra.mxu1 %v2518_v30 }
 0x1bf   : > { %1718 = vmatprep.subr.bf16.mxu0 %v2522_v34  ;;  %1750 = vmatprep.subr.bf16.mxu1 %v2524_v38 }
 0x1c2   : > { %1720 = vmatpush1.bf16.msra.mxu0 %v2528_v45  ;;  %1752 = vmatpush1.bf16.msra.mxu1 %v2530_v46 }
 0x1c3   : > { %1722 = vmatprep.subr.bf16.mxu0 %v2534_v49  ;;  %1754 = vmatprep.subr.bf16.mxu1 %v2536_v50 }
 0x1c6   : > { %1724 = vmatpush1.bf16.msra.mxu0 %v2540_v59  ;;  %1756 = vmatpush1.bf16.msra.mxu1 %v2542_v60 }
 0x1c7   : > { %1726 = vmatprep.subr.bf16.mxu0 %v2546_v0  ;;  %1758 = vmatprep.subr.bf16.mxu1 %v2548_v1 }
 0x1ca   : > { %1728 = vmatpush1.bf16.msra.mxu0 %v2554_v6  ;;  %1760 = vmatpush1.bf16.msra.mxu1 %v2556_v7 }
 0x1cb   : > { %1730 = vmatprep.subr.bf16.mxu0 %v2560_v10  ;;  %1762 = vmatprep.subr.bf16.mxu1 %v2562_v13 }
 0x1ce   : > { %1732 = vmatpush1.bf16.msra.mxu0 %v2570_v24  ;;  %1764 = vmatpush1.bf16.msra.mxu1 %v2572_v26 }
 0x1cf   : > { %1734 = vmatprep.subr.bf16.mxu0 %v2576_v31  ;;  %1766 = vmatprep.subr.bf16.mxu1 %v2578_v32 }
 0x1d2   : > { %1736 = vmatpush1.bf16.msra.mxu0 %v2582_v41  ;;  %1768 = vmatpush1.bf16.msra.mxu1 %v2584_v42 }
 0x1d3   : > { %1738 = vmatprep.subr.bf16.mxu0 %v2588_v44  ;;  %1770 = vmatprep.subr.bf16.mxu1 %v2590_v47 }
 0x1d6   : > { %1740 = vmatpush1.bf16.msra.mxu0 %v2594_v53  ;;  %1772 = vmatpush1.bf16.msra.mxu1 %v2596_v54 }
 0x1d7   : > { %1774 = vmatprep.subr.bf16.mxu0 %v2498_v11  ;;  %1806 = vmatprep.subr.bf16.mxu1 %v2500_v12 }
 0x28c   : > { %v830_v17 = vpop.f32.mrb[10].mxu0  ;;  %v901_v22 = vpop.f32.mrb[10].mxu1 }
 0x28d   : > { %v906_v27 = vadd.f32 %v830_v17, %v2641_v19  ;;  %v908_v35 = vadd.f32 %v901_v22, %v2645_v33  ;;  %v832_v37 = vpop.f32.mrb[11].mxu0  ;;  %v903_v39 = vpop.f32.mrb[11].mxu1  ;;  %v2836_v22 = vld [vmem:[#allocation23_spill] sm:$0xff] }
 0x28e   : > { %v907_v43 = vadd.f32 %v832_v37, %v2643_v28  ;;  %v909_v51 = vadd.f32 %v903_v39, %v2647_v36 }
 0x28f   : > { %v1513_v55 = vmul.f32 -1.442695, %v906_v27 }
 0x290   : > { %v1514_v57 = vmul.f32 -1.442695, %v907_v43  ;;  %v1515_v61 = vmul.f32 -1.442695, %v909_v51 }
 0x291   : > { %1992 = vpow2.f32 %v1513_v55 }
 0x292   : > { %1994 = vpow2.f32 %v1514_v57 }
 0x293   : > { %1996 = vpow2.f32 %v1515_v61 }
 0x294   : > { %1998 = vtanh.f32 %v908_v35 }
 0x29b   : > { %v1993_v11 = vpop.eup %1992 }
 0x29c   : > { %v1995_v63 = vpop.eup %1994  ;;  %v913_v12 = vadd.f32 1.0, %v1993_v11 }
 0x29d   : > { %v919_v3 = vadd.f32 1.0, %v1995_v63  ;;  %v1997_v19 = vpop.eup %1996 }
 0x29e   : > { %2000 = vrcp.f32 %v913_v12  ;;  %v1999_v33 = vpop.eup %1998  ;;  %v926_v8 = vadd.f32 1.0, %v1997_v19 }
 0x29f   : > { %2002 = vrcp.f32 %v919_v3 }
 0x2a0   : > { %2004 = vrcp.f32 %v926_v8  ;;  %v1290_v8 = vld [vmem:[#allocation11] sm:$0xff] (!%p1522_p9) }
 0x2a8   : > { %v2001_v4 = vpop.eup %2000 }
 0x2a9   : > { %v2003_v5 = vpop.eup %2002  ;;  %v930_v28 = vmul.f32 %v2001_v4, %v1999_v33 }
 0x2aa   : > { %v929_v36 = vmul.f32 %v2003_v5, %v2665_v52  ;;  %v2005_v14 = vpop.eup %2004 }
 0x2ac   : > { %v2707_v9 = vadd.f32 %v930_v28, %v929_v36  ;;  %v1291_v36 = vld [vmem:[#allocation11 + $0x8] sm:$0xff] (!%p1522_p9) }
 0x2ae   : > { %2006 = vtanh.f32 %v2707_v9 }
 0x2b8   : > { %v2007_v15 = vpop.eup %2006 }
 0x2b9   : > { %v933_v18 = vmul.f32 %v2007_v15, %v2005_v14  ;;  %v2259_v14 = vmov (!%p1522_p9), 0.0|0.0   ;;  %v1838_v15 = vpack.c.bf16 (!%p1522_p9), %v1291_v36, %v1290_v8 }
 0x2bb   : > { %1004 = vmatmul.mubr.f32.vlgmr.msra.gmra.mrb[12].mxu0 %v933_v18  ;;  %1075 = vmatmul.mubr.f32.vlgmr.msra.gmra.mrb[12].mxu1 %v933_v18  ;;  %v1293_v18 = vld [vmem:[#allocation11 + $0x18] sm:$0xff] (!%p1522_p9) }
 0x2bc   : > { %1776 = vmatpush1.bf16.msra.mxu0 %v2502_v16  ;;  %1808 = vmatpush1.bf16.msra.mxu1 %v2506_v20 }
 0x2bd   : > { %1778 = vmatprep.subr.bf16.mxu0 %v2508_v21  ;;  %1810 = vmatprep.subr.bf16.mxu1 %v2512_v25  ;;  %v2831_v25 = vld [vmem:[#allocation18_spill] sm:$0xff] }
 0x2be   : > { %1178 = vmatprep.mubr.f32.mxu0 %v2830_v2  ;;  %1249 = vmatprep.mubr.f32.mxu1 %v2830_v2  ;;  %v2835_v2 = vld [vmem:[#allocation22_spill] sm:$0xff] }
 0x2c0   : > { %1780 = vmatpush1.bf16.msra.mxu0 %v2516_v29  ;;  %1812 = vmatpush1.bf16.msra.mxu1 %v2518_v30 }
 0x2c1   : > { %1782 = vmatprep.subr.bf16.mxu0 %v2522_v34  ;;  %1814 = vmatprep.subr.bf16.mxu1 %v2524_v38  ;;  %v2832_v38 = vld [vmem:[#allocation19_spill] sm:$0xff] }
 0x2c4   : > { %1784 = vmatpush1.bf16.msra.mxu0 %v2528_v45  ;;  %1816 = vmatpush1.bf16.msra.mxu1 %v2530_v46  ;;  %v2833_v46 = vld [vmem:[#allocation20_spill] sm:$0xff] }
 0x2c5   : > { %1786 = vmatprep.subr.bf16.mxu0 %v2534_v49  ;;  %1818 = vmatprep.subr.bf16.mxu1 %v2536_v50 }
 0x2c8   : > { %1788 = vmatpush1.bf16.msra.mxu0 %v2540_v59  ;;  %1820 = vmatpush1.bf16.msra.mxu1 %v2542_v60 }
 0x2c9   : > { %1790 = vmatprep.subr.bf16.mxu0 %v2546_v0  ;;  %1822 = vmatprep.subr.bf16.mxu1 %v2548_v1 }
 0x2cc   : > { %1792 = vmatpush1.bf16.msra.mxu0 %v2554_v6  ;;  %1824 = vmatpush1.bf16.msra.mxu1 %v2556_v7 }
 0x2cd   : > { %1794 = vmatprep.subr.bf16.mxu0 %v2560_v10  ;;  %1826 = vmatprep.subr.bf16.mxu1 %v2562_v13 }
 0x2d0   : > { %1796 = vmatpush1.bf16.msra.mxu0 %v2570_v24  ;;  %1828 = vmatpush1.bf16.msra.mxu1 %v2572_v26 }
 0x2d1   : > { %1798 = vmatprep.subr.bf16.mxu0 %v2576_v31  ;;  %1830 = vmatprep.subr.bf16.mxu1 %v2578_v32 }
 0x2d4   : > { %1800 = vmatpush1.bf16.msra.mxu0 %v2582_v41  ;;  %1832 = vmatpush1.bf16.msra.mxu1 %v2584_v42 }
 0x2d5   : > { %1802 = vmatprep.subr.bf16.mxu0 %v2588_v44  ;;  %1834 = vmatprep.subr.bf16.mxu1 %v2590_v47 }
 0x2d8   : > { %1804 = vmatpush1.bf16.msra.mxu0 %v2594_v53  ;;  %1836 = vmatpush1.bf16.msra.mxu1 %v2596_v54 }
 0x2d9   : > { %1837 = vmatprep.subr.bf16.mxu0 (!%p1522_p9), %v2259_v14 }
 0x38e   : > { %v1005_v16 = vpop.f32.mrb[12].mxu0  ;;  %v1076_v20 = vpop.f32.mrb[12].mxu1 }
 0x38f   : > { %v1081_v21 = vadd.f32 %v1005_v16, %v2649_v40  ;;  %v1083_v29 = vadd.f32 %v1076_v20, %v2831_v25  ;;  %v1007_v30 = vpop.f32.mrb[13].mxu0  ;;  %v1078_v34 = vpop.f32.mrb[13].mxu1  ;;  %v2261_v16 = vmov (!%p1522_p9), 0.0   ;;  %v1295_v25 = vld [vmem:[#allocation11 + $0x28] sm:$0xff] (!%p1522_p9) }
 0x390   : > { %v1082_v45 = vadd.f32 %v1007_v30, %v2832_v38  ;;  %v1084_v49 = vadd.f32 %v1078_v34, %v2833_v46  ;;  %v1296_v30 = vld [vmem:[#allocation11 + $0x30] sm:$0xff] (!%p1522_p9)  ;;  %v1297_v34 = vld [vmem:[#allocation11 + $0x38] sm:$0xff] (!%p1522_p9)  ;;  %v1299_v46 = vld [vmem:[#allocation11 + $0x48] sm:$0xff] (!%p1522_p9) }
 0x391   : > { %v1516_v50 = vmul.f32 -1.442695, %v1081_v21  ;;  %v1294_v21 = vld [vmem:[#allocation11 + $0x20] sm:$0xff] (!%p1522_p9)  ;;  %v1847_v38 = vpack.c.bf16 (!%p1522_p9), %v1297_v34, %v1296_v30 }
 0x392   : > { %v1517_v59 = vmul.f32 -1.442695, %v1082_v45  ;;  %v1518_v60 = vmul.f32 -1.442695, %v1084_v49  ;;  %v1298_v45 = vld [vmem:[#allocation11 + $0x40] sm:$0xff] (!%p1522_p9) }
 0x393   : > { %2008 = vpow2.f32 %v1516_v50  ;;  %v1850_v49 = vpack.c.bf16 (!%p1522_p9), %v1299_v46, %v1298_v45  ;;  %v1300_v50 = vld [vmem:[#allocation11 + $0x50] sm:$0xff] (!%p1522_p9) }
 0x394   : > { %2010 = vpow2.f32 %v1517_v59  ;;  %v1301_v59 = vld [vmem:[#allocation11 + $0x58] sm:$0xff] (!%p1522_p9) }
 0x395   : > { %2012 = vpow2.f32 %v1518_v60  ;;  %v1853_v60 = vpack.c.bf16 (!%p1522_p9), %v1301_v59, %v1300_v50 }
 0x396   : > { %2014 = vtanh.f32 %v1083_v29  ;;  %v1844_v29 = vpack.c.bf16 (!%p1522_p9), %v1295_v25, %v1294_v21 }
 0x39d   : > { %v2009_v0 = vpop.eup %2008 }
 0x39e   : > { %v2011_v1 = vpop.eup %2010  ;;  %v1088_v6 = vadd.f32 1.0, %v2009_v0  ;;  %v1302_v0 = vld [vmem:[#allocation11 + $0x60] sm:$0xff] (!%p1522_p9) }
 0x39f   : > { %v1094_v7 = vadd.f32 1.0, %v2011_v1  ;;  %v2013_v10 = vpop.eup %2012  ;;  %v1303_v1 = vld [vmem:[#allocation11 + $0x68] sm:$0xff] (!%p1522_p9) }
 0x3a0   : > { %2016 = vrcp.f32 %v1088_v6  ;;  %v2015_v13 = vpop.eup %2014  ;;  %v1101_v32 = vadd.f32 1.0, %v2013_v10  ;;  %v1856_v6 = vpack.c.bf16 (!%p1522_p9), %v1303_v1, %v1302_v0  ;;  %v1305_v10 = vld [vmem:[#allocation11 + $0x78] sm:$0xff] (!%p1522_p9) }
 0x3a1   : > { %2018 = vrcp.f32 %v1094_v7  ;;  %v1304_v7 = vld [vmem:[#allocation11 + $0x70] sm:$0xff] (!%p1522_p9) }
 0x3a2   : > { %2020 = vrcp.f32 %v1101_v32 }
 0x3aa   : > { %v2017_v24 = vpop.eup %2016 }
 0x3ab   : > { %v2019_v26 = vpop.eup %2018  ;;  %v1105_v31 = vmul.f32 %v2017_v24, %v2015_v13  ;;  %v1859_v13 = vpack.c.bf16 (!%p1522_p9), %v1305_v10, %v1304_v7  ;;  %v1523_v24 = vld [vmem:[%s2806_s5] ss:$0 sm:$0xff] (!%p1522_p9) }
 0x3ac   : > { %v1104_v41 = vmul.f32 %v2019_v26, %v2707_v9  ;;  %v2021_v44 = vpop.eup %2020  ;;  %v1292_v9 = vld [vmem:[#allocation11 + $0x10] sm:$0xff] (!%p1522_p9) }
 0x3ad   : > { %v1841_v20 = vpack.c.bf16 (!%p1522_p9), %v1293_v18, %v1292_v9 }
 0x3ae   : > { %v1106_v42 = vadd.f32 %v1105_v31, %v1104_v41 }
 0x3b0   : > { %2022 = vtanh.f32 %v1106_v42 }
 0x3ba   : > { %v2023_v47 = vpop.eup %2022 }
 0x3bb   : > { %v1108_v53 = vmul.f32 %v2023_v47, %v2021_v44 }
 0x3bd   : > { %1179 = vmatmul.mubr.f32.vlgmr.msra.gmra.mrb[14].mxu0 %v1108_v53  ;;  %1250 = vmatmul.mubr.f32.vlgmr.msra.gmra.mrb[14].mxu1 %v1108_v53 }
 0x3be   : > { %1578 = vmatprep.mubr.msk.f32.mxu0 (!%p1522_p9), %vm2260_vm1, %v2261_v16  ;;  %1839 = vmatpush3.bf16.msra.mxu0 (!%p1522_p9), %v1838_v15 }
 0x3bf   : > { %1840 = vmatprep.subr.bf16.mxu0 (!%p1522_p9), %v2259_v14 }
 0x3c2   : > { %1842 = vmatpush3.bf16.msra.mxu0 (!%p1522_p9), %v1841_v20 }
 0x3c3   : > { %1843 = vmatprep.subr.bf16.mxu0 (!%p1522_p9), %v2259_v14 }
 0x3c6   : > { %1845 = vmatpush3.bf16.msra.mxu0 (!%p1522_p9), %v1844_v29 }
 0x3c7   : > { %1846 = vmatprep.subr.bf16.mxu0 (!%p1522_p9), %v2259_v14 }
 0x3ca   : > { %1848 = vmatpush3.bf16.msra.mxu0 (!%p1522_p9), %v1847_v38 }
 0x3cb   : > { %1849 = vmatprep.subr.bf16.mxu0 (!%p1522_p9), %v2259_v14 }
 0x3ce   : > { %1851 = vmatpush3.bf16.msra.mxu0 (!%p1522_p9), %v1850_v49 }
 0x3cf   : > { %1852 = vmatprep.subr.bf16.mxu0 (!%p1522_p9), %v2259_v14 }
 0x3d2   : > { %1854 = vmatpush3.bf16.msra.mxu0 (!%p1522_p9), %v1853_v60 }
 0x3d3   : > { %1855 = vmatprep.subr.bf16.mxu0 (!%p1522_p9), %v2259_v14 }
 0x3d6   : > { %1857 = vmatpush3.bf16.msra.mxu0 (!%p1522_p9), %v1856_v6 }
 0x3d7   : > { %1858 = vmatprep.subr.bf16.mxu0 (!%p1522_p9), %v2259_v14 }
 0x3da   : > { %1860 = vmatpush3.bf16.msra.mxu0 (!%p1522_p9), %v1859_v13 }
 0x490   : > { %v1180_v54 = vpop.f32.mrb[14].mxu0  ;;  %v1251_v40 = vpop.f32.mrb[14].mxu1 }
 0x491   : > { %v1256_v52 = vadd.f32 %v1180_v54, %v2834_v23  ;;  %v1258_v48 = vadd.f32 %v1251_v40, %v2659_v62  ;;  %v1182_v56 = vpop.f32.mrb[15].mxu0  ;;  %v1253_v58 = vpop.f32.mrb[15].mxu1 }
 0x492   : > { %v1257_v17 = vadd.f32 %v1182_v56, %v2835_v2  ;;  %v1259_v27 = vadd.f32 %v1253_v58, %v2836_v22 }
 0x493   : > { %v1519_v35 = vmul.f32 -1.442695, %v1256_v52 }
 0x494   : > { %v1520_v37 = vmul.f32 -1.442695, %v1257_v17  ;;  %v1521_v39 = vmul.f32 -1.442695, %v1259_v27 }
 0x495   : > { %2024 = vpow2.f32 %v1519_v35 }
 0x496   : > { %2026 = vpow2.f32 %v1520_v37 }
 0x497   : > { %2028 = vpow2.f32 %v1521_v39 }
 0x498   : > { %2030 = vtanh.f32 %v1258_v48 }
 0x49f   : > { %v2025_v43 = vpop.eup %2024 }
 0x4a0   : > { %v2027_v51 = vpop.eup %2026  ;;  %v1263_v55 = vadd.f32 1.0, %v2025_v43 }
 0x4a1   : > { %v1269_v57 = vadd.f32 1.0, %v2027_v51  ;;  %v2029_v62 = vpop.eup %2028 }
 0x4a2   : > { %2032 = vrcp.f32 %v1263_v55  ;;  %v2031_v61 = vpop.eup %2030  ;;  %v1276_v3 = vadd.f32 1.0, %v2029_v62 }
 0x4a3   : > { %2034 = vrcp.f32 %v1269_v57 }
 0x4a4   : > { %2036 = vrcp.f32 %v1276_v3 }
 0x4ac   : > { %v2033_v11 = vpop.eup %2032 }
 0x4ad   : > { %v2035_v63 = vpop.eup %2034  ;;  %v1280_v12 = vmul.f32 %v2033_v11, %v2031_v61 }
 0x4ae   : > { %v1279_v19 = vmul.f32 %v2035_v63, %v1106_v42  ;;  %v2037_v4 = vpop.eup %2036 }
 0x4b0   : > { %v1281_v33 = vadd.f32 %v1280_v12, %v1279_v19 }
 0x4b2   : > { %2038 = vtanh.f32 %v1281_v33  ;;  %1285 = vst [vmem:[#allocation4] sm:$0xff] %v1281_v33 }
 0x4b9   : > { %1289 = sbr.rel (%p1522_p9) target bundleno = 1430 (0x596), region = 68 }
 0x4bc   : > { %v2039_v5 = vpop.eup %2038 }
 0x4bd   : > { %v1283_v28 = vmul.f32 %v2039_v5, %v2037_v4 }
 0x4bf   : > { %1284 = vst [vmem:[#allocation3] sm:$0xff] %v1283_v28  ;;  %1579 = vmatmul.mubr.f32.vlgmr.msra.gmra.mrb[0].mxu0 (!%p1522_p9), %v1283_v28 }
 0x592   : > { %v1379_v26 = vpop.f32.mrb[0].mxu0 }
 0x593   : > { %v1380_v31 = vadd.f32 %v1523_v24, %v1379_v26  ;;  %v1580_v32 = vpop.f32.mrb[1].mxu0 }
 0x595   : > { %1383 = vst [vmem:[#allocation13] sm:$0xff] %v1380_v31 }
 0x596 PF: > { %s2837_s19 = sadd.s32 4294967295, %s2242_s26   ;;  %s2262_s21 = smov [#allocation13]  }
 0x597   : > { %p2757_p8 = scmp.eq.s32.totalorder %s2837_s19, 1  ;;  %s1393_s27 = sshll.u32 %s2262_s21, 4  ;;  %s1394_s27 = int_to_ptr.vmem [resolvable:$true] %s1393_s27 }
 0x598   : > { %s2154_s13 = scalar_lea.vmem %s1394_s27, 128  ;;  %p2161_p10 = scmp.lt.s32.totalorder %s1394_s27, %s1394_s27 }
 0x599   : > { %p2155_p1 = scmp.ne.s32.totalorder %s1394_s27, %s2154_s13  ;;  %p2162_p11 = scmp.lt.s32.totalorder %s2154_s13, %s2154_s13 }
 0x59b   : > { %p2156_p4 = pnand %p2155_p1, %p2757_p8  ;;  %p2163_p13 = por %p2162_p11, %p2161_p10 }
 0x59d   : > { %p2157_p5 = pneg %p2156_p4 }
 0x59f   : > { %p2164_p2 = pnand %p2163_p13, %p2157_p5 }
 0x5a1   : > { %2167 = shalt.err (!%p2164_p2)
}
 0x5a2   : > { %s2168_s8 = scalar_lea.hbm %s2807_s6, 128 }
 0x5a3   : > { %p2169_p3 = scmp.ne.s32.totalorder %s2807_s6, %s2168_s8  ;;  %p2174_p6 = scmp.lt.u32.totalorder %s2168_s8, %s2807_s6 }
 0x5a5   : > { %p2170_p12 = pnand %p2169_p3, %p2757_p8 }
 0x5a7   : > { %p2171_p0 = pneg %p2170_p12 }
 0x5a9   : > { %p2176_p7 = pnand %p2174_p6, %p2171_p0 }
 0x5ab   : > { %2179 = shalt.err (!%p2176_p7)
}
 0x5ac   : > { %1876 = dma.vmem_to_hbm [thread:$0]  (%p2757_p8), %s1394_s27, 128, %s2807_s6, [#allocation7]  }
 0x5ad   : > { %2217 = dma.done.wait (%p2757_p8), [#allocation7], 128  }
 0x5ae   : > { %2219 = vsyncadd (%p2757_p8), [#allocation7], 4294967168 }
 0x5af PF: > { %s22_s26 = sadd.s32 1, %s2242_s26   ;;  %s2839_s21 = smov %s2226_s22 }
 0x5b0   : > { %p19_p9 = scmp.ge.s32.totalorder %s22_s26, 4   ;;  %s2840_s22 = smov %s2230_s23 }
 0x5b1   : > { %s2841_s23 = smov %s2434_s14  ;;  %s2842_s24 = smov %s2238_s25 }
 0x5b2   : > { %s2843_s25 = smov %s2845_s12  ;;  %21 = sbr.rel (!%p19_p9) target bundleno = 7 (0x7), region = 105 }
 0x5b9   :  { %1406 = vsyncpa [#allocation6], 1 }
 0x5ba   :  { %1408 = vsyncpa [#allocation6 + $0x1], 1 }
 0x5bb   :  { %1409 = vsyncpa [#allocation9], 1 }
 0x5bc   :  { %1410 = vsyncpa [#allocation12], 1 }
 0x5bd   :  { %1411 = vsyncpa [#allocation7], 1 }
 0x5be   :  { %1413 = vsyncpa [#allocation7 + $0x1], 1 }

</bundles_post_ra>
